<compile_context>
chip_gen: v6e
topology: v6e:2x2x1
jax: 0.10.0
libtpu: 0.0.40
codegen_flags: <defaults>
</compile_context>

<pallas_src>
import math
import functools

import jax
import jax.numpy as jnp
from jax.experimental import pallas as pl
from jax.experimental.pallas import tpu as pltpu


def _ghost_kernel(x_ref, w1_ref, wd_ref, out_ref, *, cinit, oup, use_mxu):
    """One batch element: pointwise conv + depthwise(k=3,pad=1) conv + concat.

    x_ref  : (Cin, L)     input for this batch element (batch dim squeezed)
    w1_ref : (Cinit, Cin) pointwise conv weight
    wd_ref : (Cinit, 3)   depthwise taps (offsets -1, 0, +1)
    out_ref: (oup, L)     rows [0, Cinit) = x1, rows [Cinit, oup) = x2[:oup-Cinit]
    """
    x = x_ref[...].astype(jnp.float32)        # (Cin, L)
    w1 = w1_ref[...].astype(jnp.float32)      # (Cinit, Cin)
    L = x.shape[1]

    # primary_conv: kernel_size=1 conv == matmul over the channel axis.
    if use_mxu:
        x1 = jnp.dot(w1, x, preferred_element_type=jnp.float32)   # (Cinit, L)
    else:
        # Tiny channel counts: a few VPU broadcast-FMAs beat an almost-empty MXU.
        cin = x.shape[0]
        x1 = w1[:, 0:1] * x[0:1, :]
        for c in range(1, cin):
            x1 = x1 + w1[:, c:c + 1] * x[c:c + 1, :]

    # cheap_operation: depthwise conv (k=3, groups=Cinit, padding=1).
    # Shifted copies via non-negative XLU rolls; edge lanes zeroed to emulate
    # Conv1d zero padding (tile == one batch element, so no cross-batch leak).
    pos = jax.lax.broadcasted_iota(jnp.int32, x1.shape, 1)
    x_left = jnp.where(pos == 0, 0.0, pltpu.roll(x1, shift=1, axis=1))           # x1[l-1]
    x_right = jnp.where(pos == L - 1, 0.0, pltpu.roll(x1, shift=L - 1, axis=1))  # x1[l+1]

    wd = wd_ref[...].astype(jnp.float32)
    x2 = wd[:, 0:1] * x_left + wd[:, 1:2] * x1 + wd[:, 2:3] * x_right

    # concat([x1, x2], channel)[:oup], written directly in the output layout.
    n_new = oup - cinit
    if n_new > 0:
        out_ref[0:cinit, :] = x1.astype(out_ref.dtype)
        out_ref[cinit:oup, :] = x2[:n_new].astype(out_ref.dtype)
    else:
        out_ref[...] = x1[:oup].astype(out_ref.dtype)


def ghost_module(x, w1, wd, oup):
    """GhostModule forward. x: (N, Cin, L), w1: (Cinit, Cin), wd: (Cinit, 3)."""
    N, Cin, L = x.shape
    Cinit = w1.shape[0]
    assert w1.shape == (Cinit, Cin)
    assert wd.shape == (Cinit, 3)
    assert Cinit <= oup <= 2 * Cinit, "ratio=2 layout: Cinit <= oup <= 2*Cinit"

    dt = x.dtype
    use_mxu = not (Cin <= 8 and Cinit <= 8)
    kernel = functools.partial(_ghost_kernel, cinit=Cinit, oup=oup,
                               use_mxu=use_mxu)

    itemsize = jnp.dtype(dt).itemsize
    cost = pl.CostEstimate(
        flops=N * (2 * Cinit * Cin * L + 6 * Cinit * L),
        transcendentals=0,
        bytes_accessed=(N * Cin * L + Cinit * Cin + Cinit * 3
                        + N * oup * L) * itemsize,
    )

    # One batch element per grid step: tile boundaries coincide with batch
    # boundaries (halo handling stays local to the tile), weights stay resident
    # (index_map pinned at (0, 0)), and "parallel" lets v7x shard the batch axis
    # across both TensorCores (no-op on v5e/v6e).
    # NOTE: for realistic GhostNet sizes the per-step VMEM footprint is
    # ~(Cin + 2*Cinit + oup) * L * 4 B double-buffered; if that grows large,
    # additionally tile L in lane-aligned (multiple-of-128) chunks and raise
    # vmem_limit_bytes per generation (16/32/32 MiB scoped default on
    # v5e/v6e/v7x; 64 MiB physical on v7x).
    return pl.pallas_call(
        kernel,
        out_shape=jax.ShapeDtypeStruct((N, oup, L), dt),
        grid=(N,),
        in_specs=[
            pl.BlockSpec((pl.Squeezed(), Cin, L), lambda n: (n, 0, 0)),
            pl.BlockSpec((Cinit, Cin), lambda n: (0, 0)),
            pl.BlockSpec((Cinit, 3), lambda n: (0, 0)),
        ],
        out_specs=pl.BlockSpec((pl.Squeezed(), oup, L), lambda n: (n, 0, 0)),
        compiler_params=pltpu.CompilerParams(
            dimension_semantics=("parallel",)),
        cost_estimate=cost,
    )(x, w1, wd)


def ghost_module_ref(x, w1, wd, oup):
    """Pure-JAX reference mirroring the PyTorch module."""
    x1 = jnp.einsum("oc,ncl->nol", w1, x)                         # pointwise conv
    x1p = jnp.pad(x1, ((0, 0), (0, 0), (1, 1)))
    x2 = (wd[None, :, 0:1] * x1p[:, :, 0:-2]
          + wd[None, :, 1:2] * x1p[:, :, 1:-1]
          + wd[None, :, 2:3] * x1p[:, :, 2:])                     # depthwise conv
    out = jnp.concatenate([x1, x2], axis=1)
    return out[:, :oup, :]


if __name__ == "__main__":
    # Module config (matches GhostModule(inp, oup) defaults: kernel_size=1,
    # ratio=2, dw_size=3, stride=1)
    inp, oup = 4, 6
    ratio = 2
    init_channels = math.ceil(oup / ratio)        # 3
    new_channels = init_channels * (ratio - 1)    # 3

    N, L = 2, 16

    key = jax.random.PRNGKey(0)
    kx, kw1, kwd = jax.random.split(key, 3)
    x = jax.random.normal(kx, (N, inp, L), dtype=jnp.float32)
    # Weights (shapes from nn.Conv1d in __init__):
    #   primary_conv weight:    (init_channels, inp, 1) -> squeezed to (init, inp)
    #   cheap_operation weight: (new_channels, 1, 3)    -> squeezed to (init, 3)
    w1 = jax.random.normal(kw1, (init_channels, inp), dtype=jnp.float32) * 0.5
    wd = jax.random.normal(kwd, (new_channels, 3), dtype=jnp.float32) * 0.5

    out = jax.block_until_ready(ghost_module(x, w1, wd, oup))

    ref = ghost_module_ref(x, w1, wd, oup)
    assert out.shape == (N, oup, L), out.shape
    assert jnp.allclose(out, ref, atol=1e-5, rtol=1e-5), float(
        jnp.max(jnp.abs(out - ref)))

    print("KERNEL_OK")
</pallas_src>

<mosaic_0001>
module attributes {stable_mosaic.version = 11 : i64} {
  func.func @_ghost_kernel(%arg0: i32, %arg1: memref<1x4x16xf32, #tpu.memory_space<vmem>>, %arg2: memref<3x4xf32, #tpu.memory_space<vmem>>, %arg3: memref<3x3xf32, #tpu.memory_space<vmem>>, %arg4: memref<1x6x16xf32, #tpu.memory_space<vmem>>) attributes {dimension_semantics = [#tpu.dimension_semantics<parallel>], iteration_bounds = array<i64: 2>, scalar_prefetch = 0 : i64, scratch_operands = 0 : i64, tpu.core_type = #tpu.core_type<tc>, window_params = [{transform_indices = @transform_0, window_bounds = array<i64: 1, 4, 16>}, {pipeline_mode = #tpu.pipeline_mode<synchronous>, transform_indices = @transform_1, window_bounds = array<i64: 3, 4>}, {pipeline_mode = #tpu.pipeline_mode<synchronous>, transform_indices = @transform_2, window_bounds = array<i64: 3, 3>}, {transform_indices = @transform_3, window_bounds = array<i64: 1, 6, 16>}]} {
    %c0 = arith.constant 0 : index
    %c0_0 = arith.constant 0 : index
    %c0_1 = arith.constant 0 : index
    %0 = vector.load %arg1[%c0, %c0_0, %c0_1] : memref<1x4x16xf32, #tpu.memory_space<vmem>>, vector<1x4x16xf32>
    %1 = vector.shape_cast %0 : vector<1x4x16xf32> to vector<4x16xf32>
    %c0_2 = arith.constant 0 : index
    %c0_3 = arith.constant 0 : index
    %2 = vector.load %arg2[%c0_2, %c0_3] : memref<3x4xf32, #tpu.memory_space<vmem>>, vector<3x4xf32>
    %3 = vector.extract_strided_slice %2 {offsets = [0, 0], sizes = [3, 1], strides = [1, 1]} : vector<3x4xf32> to vector<3x1xf32>
    %4 = vector.extract_strided_slice %1 {offsets = [0, 0], sizes = [1, 16], strides = [1, 1]} : vector<4x16xf32> to vector<1x16xf32>
    %5 = vector.broadcast %3 : vector<3x1xf32> to vector<3x16xf32>
    %6 = vector.broadcast %4 : vector<1x16xf32> to vector<3x16xf32>
    %7 = arith.mulf %5, %6 : vector<3x16xf32>
    %8 = vector.extract_strided_slice %2 {offsets = [0, 1], sizes = [3, 1], strides = [1, 1]} : vector<3x4xf32> to vector<3x1xf32>
    %9 = vector.extract_strided_slice %1 {offsets = [1, 0], sizes = [1, 16], strides = [1, 1]} : vector<4x16xf32> to vector<1x16xf32>
    %10 = vector.broadcast %8 : vector<3x1xf32> to vector<3x16xf32>
    %11 = vector.broadcast %9 : vector<1x16xf32> to vector<3x16xf32>
    %12 = arith.mulf %10, %11 : vector<3x16xf32>
    %13 = arith.addf %7, %12 : vector<3x16xf32>
    %14 = vector.extract_strided_slice %2 {offsets = [0, 2], sizes = [3, 1], strides = [1, 1]} : vector<3x4xf32> to vector<3x1xf32>
    %15 = vector.extract_strided_slice %1 {offsets = [2, 0], sizes = [1, 16], strides = [1, 1]} : vector<4x16xf32> to vector<1x16xf32>
    %16 = vector.broadcast %14 : vector<3x1xf32> to vector<3x16xf32>
    %17 = vector.broadcast %15 : vector<1x16xf32> to vector<3x16xf32>
    %18 = arith.mulf %16, %17 : vector<3x16xf32>
    %19 = arith.addf %13, %18 : vector<3x16xf32>
    %20 = vector.extract_strided_slice %2 {offsets = [0, 3], sizes = [3, 1], strides = [1, 1]} : vector<3x4xf32> to vector<3x1xf32>
    %21 = vector.extract_strided_slice %1 {offsets = [3, 0], sizes = [1, 16], strides = [1, 1]} : vector<4x16xf32> to vector<1x16xf32>
    %22 = vector.broadcast %20 : vector<3x1xf32> to vector<3x16xf32>
    %23 = vector.broadcast %21 : vector<1x16xf32> to vector<3x16xf32>
    %24 = arith.mulf %22, %23 : vector<3x16xf32>
    %25 = arith.addf %19, %24 : vector<3x16xf32>
    %26 = tpu.iota {dimensions = array<i32: 1>} : vector<3x16xi32>
    %c0_i32 = arith.constant 0 : i32
    %27 = vector.broadcast %c0_i32 : i32 to vector<3x16xi32>
    %28 = arith.cmpi eq, %26, %27 : vector<3x16xi32>
    %c1_i32 = arith.constant 1 : i32
    %29 = tpu.dynamic_rotate %25 by %c1_i32 dim 1 : vector<3x16xf32>, i32 -> vector<3x16xf32>
    %cst = arith.constant 0.000000e+00 : f32
    %30 = vector.broadcast %cst : f32 to vector<3x16xf32>
    %31 = arith.select %28, %30, %29 : vector<3x16xi1>, vector<3x16xf32>
    %c15_i32 = arith.constant 15 : i32
    %32 = vector.broadcast %c15_i32 : i32 to vector<3x16xi32>
    %33 = arith.cmpi eq, %26, %32 : vector<3x16xi32>
    %c15_i32_4 = arith.constant 15 : i32
    %34 = tpu.dynamic_rotate %25 by %c15_i32_4 dim 1 : vector<3x16xf32>, i32 -> vector<3x16xf32>
    %cst_5 = arith.constant 0.000000e+00 : f32
    %35 = vector.broadcast %cst_5 : f32 to vector<3x16xf32>
    %36 = arith.select %33, %35, %34 : vector<3x16xi1>, vector<3x16xf32>
    %c0_6 = arith.constant 0 : index
    %c0_7 = arith.constant 0 : index
    %37 = vector.load %arg3[%c0_6, %c0_7] : memref<3x3xf32, #tpu.memory_space<vmem>>, vector<3x3xf32>
    %38 = vector.extract_strided_slice %37 {offsets = [0, 0], sizes = [3, 1], strides = [1, 1]} : vector<3x3xf32> to vector<3x1xf32>
    %39 = vector.broadcast %38 : vector<3x1xf32> to vector<3x16xf32>
    %40 = arith.mulf %39, %31 : vector<3x16xf32>
    %41 = vector.extract_strided_slice %37 {offsets = [0, 1], sizes = [3, 1], strides = [1, 1]} : vector<3x3xf32> to vector<3x1xf32>
    %42 = vector.broadcast %41 : vector<3x1xf32> to vector<3x16xf32>
    %43 = arith.mulf %42, %25 : vector<3x16xf32>
    %44 = arith.addf %40, %43 : vector<3x16xf32>
    %45 = vector.extract_strided_slice %37 {offsets = [0, 2], sizes = [3, 1], strides = [1, 1]} : vector<3x3xf32> to vector<3x1xf32>
    %46 = vector.broadcast %45 : vector<3x1xf32> to vector<3x16xf32>
    %47 = arith.mulf %46, %36 : vector<3x16xf32>
    %48 = arith.addf %44, %47 : vector<3x16xf32>
    %c0_8 = arith.constant 0 : index
    %c0_9 = arith.constant 0 : index
    %c0_10 = arith.constant 0 : index
    %49 = vector.load %arg4[%c0_8, %c0_9, %c0_10] : memref<1x6x16xf32, #tpu.memory_space<vmem>>, vector<1x3x16xf32>
    %50 = vector.shape_cast %49 : vector<1x3x16xf32> to vector<3x16xf32>
    %51 = vector.shape_cast %25 : vector<3x16xf32> to vector<1x3x16xf32>
    tpu.vector_store %arg4[%c0_8, %c0_9, %c0_10], %51 {strides = array<i32>} : memref<1x6x16xf32, #tpu.memory_space<vmem>>, vector<1x3x16xf32>,
    %c0_11 = arith.constant 0 : index
    %c3 = arith.constant 3 : index
    %c0_12 = arith.constant 0 : index
    %52 = vector.load %arg4[%c0_11, %c3, %c0_12] : memref<1x6x16xf32, #tpu.memory_space<vmem>>, vector<1x3x16xf32>
    %53 = vector.shape_cast %52 : vector<1x3x16xf32> to vector<3x16xf32>
    %54 = vector.shape_cast %48 : vector<3x16xf32> to vector<1x3x16xf32>
    tpu.vector_store %arg4[%c0_11, %c3, %c0_12], %54 {strides = array<i32>} : memref<1x6x16xf32, #tpu.memory_space<vmem>>, vector<1x3x16xf32>,
    return
  }
  func.func @transform_0(%arg0: i32) -> (i32, i32, i32) {
    %c0_i32 = arith.constant 0 : i32
    %c0_i32_0 = arith.constant 0 : i32
    %c0_i32_1 = arith.constant 0 : i32
    return %arg0, %c0_i32, %c0_i32_0 : i32, i32, i32
  }
  func.func @transform_1(%arg0: i32) -> (i32, i32) {
    %c0_i32 = arith.constant 0 : i32
    %c0_i32_0 = arith.constant 0 : i32
    %c0_i32_1 = arith.constant 0 : i32
    return %c0_i32, %c0_i32_0 : i32, i32
  }
  func.func @transform_2(%arg0: i32) -> (i32, i32) {
    %c0_i32 = arith.constant 0 : i32
    %c0_i32_0 = arith.constant 0 : i32
    %c0_i32_1 = arith.constant 0 : i32
    return %c0_i32, %c0_i32_0 : i32, i32
  }
  func.func @transform_3(%arg0: i32) -> (i32, i32, i32) {
    %c0_i32 = arith.constant 0 : i32
    %c0_i32_0 = arith.constant 0 : i32
    %c0_i32_1 = arith.constant 0 : i32
    return %arg0, %c0_i32, %c0_i32_0 : i32, i32, i32
  }
}

</mosaic_0001>

<bundles_post_ra>
// kernel: tpu_custom_call.1
= control target key start
LH: loop header
LB: loop body
LE: loop exit
PB: predicated region body
PF: predicated region fallthrough
CT: control target
= control target key end

     0   :  { %8 = vsyncpa [#allocation3], 0  ;;  %s751_s0 = inlined_call_operand.hbm [shape: f32[2,4,16], index: 0, kind: input, shape index: {}]   ;;  %s752_s1 = inlined_call_operand.hbm [shape: f32[3,4], index: 1, kind: input, shape index: {}]   ;;  %s753_s2 = inlined_call_operand.hbm [shape: f32[3,3], index: 2, kind: input, shape index: {}]   ;;  %s754_s3 = inlined_call_operand.vmem [shape: f32[2,6,16], index: 3, kind: output, shape index: {}]  }
   0x1   :  { %10 = vsyncpa [#allocation3 + $0x1], 0 }
   0x2   :  { %11 = vsyncpa [#allocation5], 0  ;;  %s617_s12 = smov 0   ;;  %s619_s13 = smov 0  }
   0x3   :  { %s621_s14 = smov 0   ;;  %s623_s15 = smov 0  }
   0x4 LB: > { %s636_s16 = sadd.s32 4294967295, %s585_s15   ;;  %p37_p0 = scmp.ne.s32.totalorder %s577_s13, %s573_s12  ;;  %s585_s15 = sphi %s623_s15, %s769_s15   ;;  %s581_s14 = sphi %s621_s14, %s768_s14   ;;  %s577_s13 = sphi %s619_s13, %s767_s13   ;;  %s573_s12 = sphi %s617_s12, %s766_s12  }
   0x5   : > { %p755_p1 = scmp.eq.s32.totalorder %s636_s16, 0  ;;  %p380_p2 = scmp.ge.s32.totalorder %s585_s15, 1 }
   0x6   : > { %p116_p3 = scmp.lt.s32.totalorder %s585_s15, 3  ;;  %s587_s19 = smov [#allocation4]  }
   0x7   : > { %p644_p4 = por %p755_p1, %p37_p0  ;;  %s129_s20 = sshll.u32 %s587_s19, 4  ;;  %s130_s20 = int_to_ptr.vmem [resolvable:$true] %s129_s20 }
   0x8   : > { %p648_p5 = pnand %p380_p2, %p116_p3  ;;  %s588_s21 = smov [#allocation6]  }
   0x9   : > { %s758_s17 = scalar_select %p644_p4, 1, 0 }
   0xa   : > { %s759_s18 = scalar_select %p648_p5, 1, 0 }
   0xb   : > { %p403_p6 = pneg %p648_p5  ;;  %s140_s22 = sshll.u32 %s588_s21, 4  ;;  %s141_s22 = int_to_ptr.vmem [resolvable:$true] %s140_s22 }
   0xc   : > { %s661_s24 = sadd.s32 1, %s585_s15   ;;  %s478_s26 = scalar_lea.vmem %s130_s20, 64 }
   0xd   : > { %p656_p7 = pnand %p403_p6, %p755_p1  ;;  %s21_s25 = ssub.s32 %s585_s15, %s661_s24 }
   0xe   : > { %p479_p9 = scmp.ne.s32.totalorder %s130_s20, %s478_s26  ;;  %p486_p12 = scmp.lt.s32.totalorder %s130_s20, %s130_s20 }
   0xf   : > { %p469_p8 = pneg %p656_p7  ;;  %p487_p13 = scmp.lt.s32.totalorder %s478_s26, %s478_s26 }
  0x11   : > { %p481_p10 = pnand %p479_p9, %p469_p8  ;;  %p488_p0 = por %p487_p13, %p486_p12 }
  0x13   : > { %p482_p11 = pneg %p481_p10 }
  0x15   : > { %p489_p2 = pnand %p488_p0, %p482_p11 }
  0x17   : > { %492 = shalt.err (!%p489_p2)
}
  0x18   : > { %406 = dma.hbm_to_vmem [thread:$0]  (!%p656_p7), %s752_s1, 64, %s130_s20, [#allocation5]  }
  0x19   : > { %s504_s29 = scalar_lea.vmem %s141_s22, 64  ;;  %p512_p9 = scmp.lt.s32.totalorder %s141_s22, %s141_s22 }
  0x1a   : > { %p505_p3 = scmp.ne.s32.totalorder %s141_s22, %s504_s29  ;;  %p513_p10 = scmp.lt.s32.totalorder %s504_s29, %s504_s29 }
  0x1c   : > { %p507_p6 = pnand %p505_p3, %p469_p8  ;;  %p514_p4 = por %p513_p10, %p512_p9 }
  0x1e   : > { %p508_p1 = pneg %p507_p6 }
  0x20   : > { %p515_p5 = pnand %p514_p4, %p508_p1 }
  0x22   : > { %518 = shalt.err (!%p515_p5)
}
  0x23   : > { %409 = dma.hbm_to_vmem [thread:$0]  (!%p656_p7), %s753_s2, 64, %s141_s22, [#allocation5]  }
  0x24   : > { %p22_p8 = scmp.eq.s32.totalorder %s21_s25, 0  ;;  %s24_s5 = sadd.s32 1, %s581_s14 }
  0x25   : > { %p31_p11 = scmp.ne.s32.totalorder %s581_s14, %s577_s13  ;;  %p32_p12 = scmp.eq.s32.totalorder %s585_s15, 0 }
  0x26   : > { %s688_s6 = scalar_select %p22_p8, %s581_s14, %s24_s5  }
  0x27   : > { %p33_p1 = por %p32_p12, %p31_p11  ;;  %p416_p4 = scmp.lt.s32.totalorder %s585_s15, 2 }
  0x28   : > { %s151_s7 = sand.u32 1, %s581_s14   ;;  %s385_s8 = sshll.u32 %s585_s15, 6 }
  0x29   : > { %s384_s9 = sshll.u32 %s151_s7, 2  ;;  %s696_s12 = scalar_lea.hbm %s751_s0, %s385_s8 }
  0x2a   : > { %s155_s19 = scalar_lea.vmem [#allocation2], %s384_s9  ;;  %p698_p5 = pnand %p416_p4, %p33_p1 }
  0x2b   : > { %s162_s20 = sshll.u32 %s155_s19, 4  ;;  %s152_s22 = scalar_lea.sflag [#allocation3], %s151_s7  ;;  %s163_s20 = int_to_ptr.vmem [resolvable:$true] %s162_s20 }
  0x2c   : > { %s519_s23 = scalar_lea.hbm %s696_s12, 64  ;;  %p521_p13 = pneg %p698_p5 }
  0x2d   : > { %p520_p7 = scmp.ne.s32.totalorder %s696_s12, %s519_s23  ;;  %s524_s26 = scalar_lea.hbm %s751_s0, 128 }
  0x2e   : > { %p525_p3 = scmp.lt.s32.totalorder %s696_s12, %s751_s0  ;;  %p526_p6 = scmp.lt.s32.totalorder %s524_s26, %s519_s23 }
  0x2f   : > { %p522_p0 = pnand %p521_p13, %p520_p7 }
  0x30   : > { %p527_p9 = por %p526_p6, %p525_p3 }
  0x31   : > { %p523_p2 = pneg %p522_p0 }
  0x33   : > { %p528_p10 = pnand %p527_p9, %p523_p2 }
  0x35   : > { %531 = shalt.err (!%p528_p10)
}
  0x36   : > { %s532_s29 = scalar_lea.vmem %s163_s20, 64  ;;  %s589_s30 = smov [#allocation2]  }
  0x37   : > { %p533_p8 = scmp.ne.s32.totalorder %s163_s20, %s532_s29  ;;  %s537_s4 = sshll.u32 %s589_s30, 4  ;;  %s538_s4 = int_to_ptr.vmem [resolvable:$false] %s537_s4 }
  0x38   : > { %s539_s5 = scalar_lea.vmem %s538_s4, 128  ;;  %p540_p1 = scmp.lt.s32.totalorder %s163_s20, %s538_s4 }
  0x39   : > { %p535_p11 = pnand %p533_p8, %p521_p13  ;;  %p541_p4 = scmp.lt.s32.totalorder %s539_s5, %s532_s29 }
  0x3b   : > { %p536_p12 = pneg %p535_p11  ;;  %p542_p7 = por %p541_p4, %p540_p1 }
  0x3d   : > { %p543_p0 = pnand %p542_p7, %p536_p12 }
  0x3f   : > { %546 = shalt.err (!%p543_p0)
}
  0x40   : > { %413 = dma.hbm_to_vmem [thread:$0]  (!%p698_p5), %s696_s12, 64, %s163_s20, %s152_s22  }
  0x41   : > { %p762_p2 = scmp.ne.s32.totalorder %s759_s18, 0 }
  0x42   : > { %s173_s7 = sand.u32 (!%p762_p2), 1, %s577_s13   ;;  %p763_p13 = scmp.ne.s32.totalorder (!%p762_p2), %s758_s17, 0 }
  0x43   : > { %171 = sbr.rel (%p762_p2) target bundleno = 570 (0x23a), region = 32  ;;  %s387_s8 = sshll.u32 (!%p762_p2), %s173_s7, 2 }
  0x44   : > { %s174_s9 = scalar_lea.sflag (!%p762_p2), [#allocation3], %s173_s7  ;;  %s177_s10 = scalar_lea.vmem (!%p762_p2), [#allocation2], %s387_s8 }
  0x48   : > { %564 = dma.done.wait (%p763_p13), %s174_s9, 64  }
  0x49   : > { %566 = vsyncadd (%p763_p13), %s174_s9, 4294967232  ;;  %p764_p3 = scmp.eq.s32.totalorder %s636_s16, 0 }
  0x4b   : > { %568 = dma.done.wait (%p764_p3), [#allocation5], 128   ;;  %p765_p6 = pmov %p764_p3 }
  0x4c   : > { %v590_v0 = vmov 0   ;;  %v591_v1 = vmov 2   ;;  %v212_v2 = vld [vmem:[#allocation4] sm:$0x7]  ;;  %v592_v3 = vmov 1   ;;  %v593_v4 = vmov 3  }
  0x4d   : > { %570 = vsyncadd (%p765_p6), [#allocation5], 4294967168  ;;  %460 = vset.pattern.permute.xlu0 %v590_v0  ;;  %462 = vset.pattern.permute.xlu1 %v591_v1  ;;  %v218_v5 = vlaneseq  ;;  %v211_v9 = vld [vmem:[%s177_s10] sm:$0xf]  ;;  %p207_p5 = scmp.lt.s32.totalorder %s636_s16, 1  ;;  %vm292_vm0 = vcmask 124928  }
  0x4e   : > { %215 = vperm.xlu0 %460, %v212_v2   ;;  %234 = vperm.xlu1 %462, %v212_v2   ;;  %s594_s19 = smov 16   ;;  %v273_v27 = vld [vmem:[#allocation6] sm:$0x7]  ;;  %vm256_vm1 = vcmask 1047680   ;;  %s596_s20 = smov 113  }
  0x4f   : > { %v219_v6 = vshrl.u32 %v218_v5, 7  ;;  %s771_s16 = smov (!%p207_p5, %s636_s16), 1  ;;  %v254_v34 = vand.u32 127, %v218_v5 }
  0x50   : > { %s390_s17 = sshll.u32 %s771_s16, 3  ;;  %s595_s16 = smov 127  }
  0x51   : > { %v220_v7 = vsub.s32 0, %v219_v6  ;;  %v229_v8 = vsub.s32 1, %v219_v6  ;;  %v239_v11 = vsub.s32 2, %v219_v6  ;;  %v249_v13 = vsub.s32 3, %v219_v6  ;;  %s732_s12 = scalar_lea.vmem %s754_s3, %s390_s17 }
  0x52   : > { %461 = vset.pattern.permute.xlu0 %v592_v3  ;;  %463 = vset.pattern.permute.xlu1 %v593_v4  ;;  %vm255_vm2 = vcmp.eq.s32.totalorder %v254_v34, 0  ;;  %vm268_vm3 = vcmp.eq.s32.totalorder %v254_v34, 15 }
  0x53   : > { %224 = vperm.xlu0 %461, %v212_v2   ;;  %244 = vperm.xlu1 %463, %v212_v2   ;;  %v221_v14 = vrot.slane %v211_v9, %v220_v7  ;;  %v230_v15 = vrot.slane %v211_v9, %v229_v8  ;;  %v240_v16 = vrot.slane %v211_v9, %v239_v11 }
  0x54   : > { %v250_v17 = vrot.slane %v211_v9, %v249_v13 }
  0x57   : > { %464 = vset.pattern.permute.xlu1 %v590_v0 }
  0xc9   : > { %v216_v10 = vpop.permute.xlu0 %215  ;;  %v235_v12 = vpop.permute.xlu1 %234 }
  0xca   : > { %v222_v20 = vmul.f32 %v221_v14, %v216_v10  ;;  %v241_v22 = vmul.f32 %v240_v16, %v235_v12 }
  0xce   : > { %v225_v18 = vpop.permute.xlu0 %224  ;;  %v245_v19 = vpop.permute.xlu1 %244 }
  0xcf   : > { %v231_v21 = vmul.f32 %v230_v15, %v225_v18  ;;  %v251_v24 = vmul.f32 %v250_v17, %v245_v19 }
  0xd1   : > { %v232_v23 = vadd.f32 %v231_v21, %v222_v20 }
  0xd3   : > { %v242_v25 = vadd.f32 %v241_v22, %v232_v23 }
  0xd5   : > { %v252_v26 = vadd.f32 %v251_v24, %v242_v25 }
  0xd7   : > { %293 = vst.msk [vmem:[%s732_s12] sm:$0x7] %vm292_vm0, %v252_v26  ;;  %257 = vrot.lane.b32.xlu1 %v252_v26, %s594_s19 }
  0xdb   : > { %276 = vperm.xlu1 %464, %v273_v27  }
  0xdf   : > { %465 = vset.pattern.permute.xlu1 %v591_v1 }
  0xe0   : > { %287 = vperm.xlu1 %465, %v273_v27  }
 0x149   : > { %v258_v28 = vpop.permute.xlu1 %257 }
 0x14a   : > { %v259_v29 = vsel %vm256_vm1, %v258_v28, %v252_v26 }
 0x14b   : > { %260 = vrot.lane.b32.xlu0 %v259_v29, %s594_s19 }
 0x14f   : > { %281 = vperm.xlu0 %461, %v273_v27  }
 0x153   : > { %466 = vset.pattern.permute.xlu0 %v591_v1 }
 0x156   : > { %v277_v32 = vpop.permute.xlu1 %276 }
 0x15b   : > { %v288_v33 = vpop.permute.xlu1 %287 }
 0x1bd   : > { %v261_v30 = vpop.permute.xlu0 %260 }
 0x1be   : > { %v262_v31 = vsel %vm256_vm1, %v261_v30, %v252_v26 }
 0x1bf   : > { %269 = vrot.lane.b32.xlu1 %v262_v31, %s595_s16  ;;  %264 = vrot.lane.b32.xlu0 %v262_v31, %s596_s20 }
 0x1ca   : > { %v282_v35 = vpop.permute.xlu0 %281 }
 0x1cb   : > { %v284_v40 = vmul.f32 %v282_v35, %v252_v26 }
 0x231   : > { %v265_v36 = vpop.permute.xlu0 %264  ;;  %v270_v37 = vpop.permute.xlu1 %269 }
 0x232   : > { %v267_v38 = vsel %vm255_vm2, 0.0, %v265_v36  ;;  %v272_v39 = vsel %vm268_vm3, 0.0, %v270_v37 }
 0x233   : > { %v279_v41 = vmul.f32 %v277_v32, %v267_v38  ;;  %v290_v43 = vmul.f32 %v288_v33, %v272_v39 }
 0x235   : > { %v285_v42 = vadd.f32 %v284_v40, %v279_v41 }
 0x237   : > { %v291_v44 = vadd.f32 %v290_v43, %v285_v42 }
 0x239   : > { %294 = vst.msk [vmem:[%s732_s12 + $0x3] sm:$0x7] %vm292_vm0, %v291_v44 }
 0x23a PF: > { %p14_p9 = scmp.ge.s32.totalorder %s661_s24, 4   ;;  %s766_s12 = smov %s577_s13 }
 0x23b   : > { %s767_s13 = smov %s581_s14  ;;  %s768_s14 = smov %s688_s6 }
 0x23c   : > { %s769_s15 = smov %s661_s24  ;;  %16 = sbr.rel (!%p14_p9) target bundleno = 4 (0x4), region = 80 }
 0x241   :  { %314 = vsyncpa [#allocation3], 1 }
 0x242   :  { %316 = vsyncpa [#allocation3 + $0x1], 1 }
 0x243   :  { %317 = vsyncpa [#allocation5], 1 }

</bundles_post_ra>
